<compile_context>
chip_gen: v5e
topology: v5e:2x2
jax: 0.10.0
libtpu: 0.0.40
codegen_flags: <defaults>
</compile_context>

<pallas_src>
import jax
import jax.numpy as jnp
from jax import lax
from jax.experimental import pallas as pl
from jax.experimental.pallas import tpu as pltpu

# ---- synthetic "config file" values (experiments/relationnet/config) ----
HIDDEN_SIZE = 32
DROPOUT = 0.0          # eval mode -> identity
N_LAYERS = 3           # -> (N_LAYERS - 1) = 2 hidden blocks + final Linear
BN_EPS = 1e-5

INPUT_SIZE = 64        # feature dim of the relation pairs fed to the module
BATCH = 40             # number of (query, proto) relation pairs in the episode
MAX_TILE_N = 512       # pairs per grid step when the batch does not fit one tile


def relation_kernel(x_ref, w0_ref, w1_ref, vec_ref, out_ref):
    """Fused forward: 2 x (Linear+BN folded -> ReLU) -> (H->1) reduce -> sigmoid.

    x_ref   : (TILE_N, D)  f32    input pairs, natural layout (cast in-kernel)
    w0_ref  : (H, D)       bf16   folded layer-0 weights (transposed)
    w1_ref  : (H, H)       bf16   folded layer-1 weights (transposed)
    vec_ref : (H, 4)       f32    packed columns [c0, c1, wf, bf(broadcast)]
    out_ref : (1, TILE_N)  f32    sigmoid logits, lane-dense
    """
    c0 = vec_ref[:, 0:1]          # (H, 1) folded bias+BN shift, layer 0
    c1 = vec_ref[:, 1:2]          # (H, 1) folded bias+BN shift, layer 1
    wf = vec_ref[:, 2:3]          # (H, 1) final Linear weights
    bf = vec_ref[0:1, 3:4]        # (1, 1) final Linear bias

    # In-kernel bf16 cast of the streamed tile (no wrapper-side astype op).
    x = x_ref[...].astype(jnp.bfloat16)                # (TILE_N, D)

    # hidden block 0: Linear (BN/bias folded) + ReLU  (Dropout = identity in eval)
    # Contract D on both operands: W0(H,D) . x(TILE,D)^T -> (H, TILE), no wrapper transpose.
    h = lax.dot_general(w0_ref[...], x,
                        dimension_numbers=(((1,), (1,)), ((), ())),
                        preferred_element_type=jnp.float32)
    h = jnp.maximum(h + c0, 0.0)                       # (H, TILE_N) f32

    # hidden block 1
    h = jnp.dot(w1_ref[...], h.astype(jnp.bfloat16),
                preferred_element_type=jnp.float32)
    h = jnp.maximum(h + c1, 0.0)                       # (H, TILE_N) f32

    # final Linear (H -> 1) as VPU multiply + sublane reduce (skips an MXU pass),
    # producing a lane-dense (1, TILE_N) row, then sigmoid.
    y = jnp.sum(h * wf, axis=0, keepdims=True) + bf    # (1, TILE_N)
    out_ref[...] = jax.nn.sigmoid(y)


def relation_module_forward(x, params, *, max_tile_n=MAX_TILE_N):
    """x: (N, INPUT_SIZE) float32 -> (N, 1) float32."""
    w0f, c0, w1f, c1, wf, bf = params
    n, d = x.shape
    hdim = w0f.shape[1]

    # Single grid step if the whole batch fits one tile (best on single-TC
    # v5e/v6e); otherwise stream 512-pair tiles with a ragged final block
    # (no jnp.pad, no extra HBM copy of x).
    tile_n = n if n <= max_tile_n else max_tile_n      # max_tile_n is a multiple of (8, 128)
    num_tiles = pl.cdiv(n, tile_n)

    # Tiny, one-time weight plumbing (H*D + H*H elements): transpose + bf16 cast
    # and pack all per-feature vectors into ONE (H, 4) operand.
    w0_t = w0f.T.astype(jnp.bfloat16)                                   # (H, D)
    w1_t = w1f.T.astype(jnp.bfloat16)                                   # (H, H)
    vec = jnp.concatenate(
        [c0.T, c1.T, wf, jnp.broadcast_to(bf, (hdim, 1))], axis=1
    ).astype(jnp.float32)                                               # (H, 4)

    cost = pl.CostEstimate(
        flops=2 * n * (d * hdim + hdim * hdim + hdim),
        transcendentals=n,                  # sigmoid exp per pair
        bytes_accessed=(x.size * 4 + (w0_t.size + w1_t.size) * 2
                        + vec.size * 4 + n * 4),
    )

    grid_spec = pltpu.PrefetchScalarGridSpec(
        num_scalar_prefetch=0,
        grid=(num_tiles,),
        in_specs=[
            pl.BlockSpec((tile_n, d), lambda i: (i, 0)),        # stream x in natural layout
            pl.BlockSpec((hdim, d), lambda i: (0, 0)),          # weights VMEM-resident
            pl.BlockSpec((hdim, hdim), lambda i: (0, 0)),
            pl.BlockSpec((hdim, 4), lambda i: (0, 0)),
        ],
        out_specs=pl.BlockSpec((1, tile_n), lambda i: (0, i)),  # lane-dense store
    )

    out = pl.pallas_call(
        relation_kernel,
        out_shape=jax.ShapeDtypeStruct((1, n), jnp.float32),
        grid_spec=grid_spec,
        compiler_params=pltpu.CompilerParams(
            # v7x note: pltpu.CORE_PARALLEL on this axis would shard tiles across
            # its 2 TensorCores; "parallel" is the portable, never-worse choice.
            dimension_semantics=("parallel",),
            vmem_limit_bytes=4 * 1024 * 1024,   # footprint < 300 KiB; leave XLA headroom
        ),
        cost_estimate=cost,
    )(x, w0_t, w1_t, vec)

    return out.T     # (N, 1)


def make_params(key):
    """Deterministic synthetic parameters with offline BN/bias fold (eval mode)."""
    ks = jax.random.split(key, 14)

    def linear(kw, kb, d_in, d_out):
        bound = 1.0 / jnp.sqrt(d_in)
        w = jax.random.uniform(kw, (d_in, d_out), jnp.float32, -bound, bound)
        b = jax.random.uniform(kb, (1, d_out), jnp.float32, -bound, bound)
        return w, b

    def bn_fold(kg, kb2, km, kv, dd):
        gamma = 1.0 + 0.1 * jax.random.normal(kg, (1, dd), jnp.float32)
        beta = 0.1 * jax.random.normal(kb2, (1, dd), jnp.float32)
        running_mean = 0.1 * jax.random.normal(km, (1, dd), jnp.float32)
        running_var = jnp.abs(jax.random.normal(kv, (1, dd), jnp.float32)) + 0.5
        g = gamma / jnp.sqrt(running_var + BN_EPS)
        s = beta - running_mean * g
        return g, s

    w0, b0 = linear(ks[0], ks[1], INPUT_SIZE, HIDDEN_SIZE)
    g0, s0 = bn_fold(ks[2], ks[3], ks[4], ks[5], HIDDEN_SIZE)
    w1, b1 = linear(ks[6], ks[7], HIDDEN_SIZE, HIDDEN_SIZE)
    g1, s1 = bn_fold(ks[8], ks[9], ks[10], ks[11], HIDDEN_SIZE)
    wf, bf = linear(ks[12], ks[13], HIDDEN_SIZE, 1)   # wf: (H, 1), bf: (1, 1)

    # Offline fold: relu(((x@W + b)*g) + s) == relu(x @ (W*g) + (b*g + s))
    w0f, c0 = w0 * g0, b0 * g0 + s0
    w1f, c1 = w1 * g1, b1 * g1 + s1
    # TODO(synk): train-mode dropout / batch-stat BN would need in-kernel PRNG; eval only.
    return (w0f, c0, w1f, c1, wf, bf)


def reference_forward(x, params):
    """Pure-JAX reference using the same bf16-matmul / f32-accumulate recipe."""
    w0f, c0, w1f, c1, wf, bf = params
    bf16 = jnp.bfloat16
    h = jnp.maximum(jnp.dot(x.astype(bf16), w0f.astype(bf16),
                            preferred_element_type=jnp.float32) + c0, 0.0)
    h = jnp.maximum(jnp.dot(h.astype(bf16), w1f.astype(bf16),
                            preferred_element_type=jnp.float32) + c1, 0.0)
    return jax.nn.sigmoid(h @ wf + bf)


if __name__ == "__main__":
    key = jax.random.PRNGKey(0)
    kx, kp = jax.random.split(key)

    x = jax.random.normal(kx, (BATCH, INPUT_SIZE), jnp.float32)
    params = make_params(kp)

    out = relation_module_forward(x, params)
    out = jax.block_until_ready(out)

    ref = reference_forward(x, params)
    assert out.shape == (BATCH, 1)
    assert jnp.allclose(out, ref, atol=1e-3, rtol=1e-3), "mismatch vs reference"

    print("KERNEL_OK")
</pallas_src>

<mosaic_0001>
module attributes {stable_mosaic.version = 11 : i64} {
  func.func @relation_kernel(%arg0: i32, %arg1: memref<40x64xf32, #tpu.memory_space<vmem>>, %arg2: memref<32x64xbf16, #tpu.memory_space<vmem>>, %arg3: memref<32x32xbf16, #tpu.memory_space<vmem>>, %arg4: memref<32x4xf32, #tpu.memory_space<vmem>>, %arg5: memref<1x40xf32, #tpu.memory_space<vmem>>) attributes {dimension_semantics = [#tpu.dimension_semantics<parallel>], iteration_bounds = array<i64: 1>, scalar_prefetch = 0 : i64, scratch_operands = 0 : i64, tpu.core_type = #tpu.core_type<tc>, window_params = [{transform_indices = @transform_0, window_bounds = array<i64: 40, 64>}, {pipeline_mode = #tpu.pipeline_mode<synchronous>, transform_indices = @transform_1, window_bounds = array<i64: 32, 64>}, {pipeline_mode = #tpu.pipeline_mode<synchronous>, transform_indices = @transform_2, window_bounds = array<i64: 32, 32>}, {pipeline_mode = #tpu.pipeline_mode<synchronous>, transform_indices = @transform_3, window_bounds = array<i64: 32, 4>}, {transform_indices = @transform_4, window_bounds = array<i64: 1, 40>}]} {
    %c0 = arith.constant 0 : index
    %c0_0 = arith.constant 0 : index
    %0 = vector.load %arg4[%c0, %c0_0] : memref<32x4xf32, #tpu.memory_space<vmem>>, vector<32x1xf32>
    %c0_1 = arith.constant 0 : index
    %c1 = arith.constant 1 : index
    %1 = vector.load %arg4[%c0_1, %c1] : memref<32x4xf32, #tpu.memory_space<vmem>>, vector<32x1xf32>
    %c0_2 = arith.constant 0 : index
    %c2 = arith.constant 2 : index
    %2 = vector.load %arg4[%c0_2, %c2] : memref<32x4xf32, #tpu.memory_space<vmem>>, vector<32x1xf32>
    %c0_3 = arith.constant 0 : index
    %c3 = arith.constant 3 : index
    %3 = vector.load %arg4[%c0_3, %c3] : memref<32x4xf32, #tpu.memory_space<vmem>>, vector<1x1xf32>
    %c0_4 = arith.constant 0 : index
    %c0_5 = arith.constant 0 : index
    %4 = vector.load %arg1[%c0_4, %c0_5] : memref<40x64xf32, #tpu.memory_space<vmem>>, vector<40x64xf32>
    %5 = arith.truncf %4 : vector<40x64xf32> to vector<40x64xbf16>
    %c0_6 = arith.constant 0 : index
    %c0_7 = arith.constant 0 : index
    %6 = vector.load %arg2[%c0_6, %c0_7] : memref<32x64xbf16, #tpu.memory_space<vmem>>, vector<32x64xbf16>
    %cst = arith.constant dense<0.000000e+00> : vector<32x40xf32>
    %7 = tpu.matmul %6, %5, %cst {dimension_numbers = #tpu.dot_dimension_numbers<[1], [1], [0], [0], [0, 0, 1, 0], [], []>} : vector<32x64xbf16>, vector<40x64xbf16>, vector<32x40xf32> -> vector<32x40xf32>
    %8 = vector.broadcast %0 : vector<32x1xf32> to vector<32x40xf32>
    %9 = arith.addf %7, %8 : vector<32x40xf32>
    %cst_8 = arith.constant 0.000000e+00 : f32
    %10 = vector.broadcast %cst_8 : f32 to vector<32x40xf32>
    %11 = arith.maximumf %9, %10 : vector<32x40xf32>
    %c0_9 = arith.constant 0 : index
    %c0_10 = arith.constant 0 : index
    %12 = vector.load %arg3[%c0_9, %c0_10] : memref<32x32xbf16, #tpu.memory_space<vmem>>, vector<32x32xbf16>
    %13 = arith.truncf %11 : vector<32x40xf32> to vector<32x40xbf16>
    %cst_11 = arith.constant dense<0.000000e+00> : vector<32x40xf32>
    %14 = tpu.matmul %12, %13, %cst_11 {dimension_numbers = #tpu.dot_dimension_numbers<[1], [0], [0], [1], [0, 0, 1, 1], [], []>} : vector<32x32xbf16>, vector<32x40xbf16>, vector<32x40xf32> -> vector<32x40xf32>
    %15 = vector.broadcast %1 : vector<32x1xf32> to vector<32x40xf32>
    %16 = arith.addf %14, %15 : vector<32x40xf32>
    %cst_12 = arith.constant 0.000000e+00 : f32
    %17 = vector.broadcast %cst_12 : f32 to vector<32x40xf32>
    %18 = arith.maximumf %16, %17 : vector<32x40xf32>
    %19 = vector.broadcast %2 : vector<32x1xf32> to vector<32x40xf32>
    %20 = arith.mulf %18, %19 : vector<32x40xf32>
    %cst_13 = arith.constant dense<0.000000e+00> : vector<40xf32>
    %21 = vector.multi_reduction <add>, %20, %cst_13 [0] : vector<32x40xf32> to vector<40xf32>
    %22 = vector.shape_cast %21 : vector<40xf32> to vector<1x40xf32>
    %23 = vector.broadcast %3 : vector<1x1xf32> to vector<1x40xf32>
    %24 = arith.addf %22, %23 : vector<1x40xf32>
    %25 = arith.negf %24 : vector<1x40xf32>
    %26 = math.exp %25 : vector<1x40xf32>
    %cst_14 = arith.constant 1.000000e+00 : f32
    %27 = vector.broadcast %cst_14 : f32 to vector<1x40xf32>
    %28 = arith.addf %27, %26 : vector<1x40xf32>
    %29 = arith.divf %27, %28 : vector<1x40xf32>
    %c0_15 = arith.constant 0 : index
    %c0_16 = arith.constant 0 : index
    %30 = vector.load %arg5[%c0_15, %c0_16] : memref<1x40xf32, #tpu.memory_space<vmem>>, vector<1x40xf32>
    tpu.vector_store %arg5[%c0_15, %c0_16], %29 {strides = array<i32>} : memref<1x40xf32, #tpu.memory_space<vmem>>, vector<1x40xf32>,
    return
  }
  func.func @transform_0(%arg0: i32) -> (i32, i32) {
    %c0_i32 = arith.constant 0 : i32
    %c0_i32_0 = arith.constant 0 : i32
    return %arg0, %c0_i32 : i32, i32
  }
  func.func @transform_1(%arg0: i32) -> (i32, i32) {
    %c0_i32 = arith.constant 0 : i32
    %c0_i32_0 = arith.constant 0 : i32
    %c0_i32_1 = arith.constant 0 : i32
    return %c0_i32, %c0_i32_0 : i32, i32
  }
  func.func @transform_2(%arg0: i32) -> (i32, i32) {
    %c0_i32 = arith.constant 0 : i32
    %c0_i32_0 = arith.constant 0 : i32
    %c0_i32_1 = arith.constant 0 : i32
    return %c0_i32, %c0_i32_0 : i32, i32
  }
  func.func @transform_3(%arg0: i32) -> (i32, i32) {
    %c0_i32 = arith.constant 0 : i32
    %c0_i32_0 = arith.constant 0 : i32
    %c0_i32_1 = arith.constant 0 : i32
    return %c0_i32, %c0_i32_0 : i32, i32
  }
  func.func @transform_4(%arg0: i32) -> (i32, i32) {
    %c0_i32 = arith.constant 0 : i32
    %c0_i32_0 = arith.constant 0 : i32
    return %c0_i32, %arg0 : i32, i32
  }
}

</mosaic_0001>

<bundles_post_ra>
// kernel: tpu_custom_call.1
= control target key start
LH: loop header
LB: loop body
LE: loop exit
PB: predicated region body
PF: predicated region fallthrough
CT: control target
= control target key end

     0   :  { %9 = vsyncpa [#allocation3], 0  ;;  %s434_s0 = inlined_call_operand.hbm [shape: f32[40,64], index: 0, kind: input, shape index: {}]   ;;  %s435_s1 = inlined_call_operand.vmem [shape: bf16[32,64], index: 1, kind: input, shape index: {}]   ;;  %s436_s2 = inlined_call_operand.vmem [shape: bf16[32,32], index: 2, kind: input, shape index: {}]   ;;  %s437_s3 = inlined_call_operand.vmem [shape: f32[32,4], index: 3, kind: input, shape index: {}]   ;;  %s438_s4 = inlined_call_operand.hbm [shape: f32[1,40], index: 4, kind: output, shape index: {}]  }
   0x1   :  { %10 = vsyncpa [#allocation4], 0  ;;  %s15_s17 = sshll.u32 %s434_s0, 4  ;;  %s363_s18 = smov [#allocation2]   ;;  %s16_s17 = int_to_ptr.hbm [resolvable:$true] %s15_s17 }
   0x2   :  { %s17_s19 = sshll.u32 %s363_s18, 4  ;;  %s364_s20 = smov 128   ;;  %s18_s19 = int_to_ptr.vmem [resolvable:$true] %s17_s19 }
   0x3   :  { %s365_s21 = smov 8  }
   0x4   :  { %23 = dma.hbm_to_vmem [thread:$0]  %s16_s17, 640, %s18_s19, [#allocation3], %s364_s20, %s364_s20, %s365_s21  }
   0x5   :  { %359 = dma.done.wait [#allocation3], 640  }
   0x6   :  { %360 = vsyncadd [#allocation3], 4294966656  ;;  %v366_v0 = vmov 0   ;;  %v44_v1 = vld [vmem:[#allocation2 + $0x20] sm:$0xff]  ;;  %vm82_vm0 = vcmask 523264   ;;  %v42_v3 = vld [vmem:[#allocation2 + $0x10] sm:$0xff] }
   0x7   :  { %297 = vset.pattern.permute.xlu0 %v366_v0  ;;  %298 = vset.pattern.permute.xlu1 %v366_v0  ;;  %v47_v2 = vpack.c.bf16 %v44_v1, %v44_v1  ;;  %v43_v4 = vld [vmem:[#allocation2 + $0x18] sm:$0xff]  ;;  %v37_v5 = vld [vmem:[%s437_s3 + $0x10] sm:$0xff]  ;;  %v35_v6 = vld [vmem:[%s437_s3] sm:$0xff]  ;;  %v367_v18 = vmov 1   ;;  %v368_v26 = vmov 2   ;;  %v369_v38 = vmov 3  }
   0x8   :  { %64 = vperm.xlu0 %297, %v37_v5   ;;  %54 = vperm.xlu1 %298, %v35_v6   ;;  %v46_v8 = vpack.c.bf16 %v43_v4, %v42_v3  ;;  %v38_v9 = vld [vmem:[%s437_s3 + $0x18] sm:$0xff]  ;;  %v36_v10 = vld [vmem:[%s437_s3 + $0x8] sm:$0xff]  ;;  %v40_v12 = vld [vmem:[#allocation2] sm:$0xff]  ;;  %vm153_vm1 = vcmask 261120   ;;  %vm203_vm2 = vcmask 326656   ;;  %s251_s14 = sshll.u32 %s438_s4, 4  ;;  %s252_s14 = int_to_ptr.hbm [resolvable:$true] %s251_s14 }
   0x9   :  { %v96_v7 = vsel %vm82_vm0, %v47_v2, 0  ;;  %v41_v13 = vld [vmem:[#allocation2 + $0x8] sm:$0xff]  ;;  %v282_v17 = vld [vmem:[%s435_s1] sm:$0xff]  ;;  %299 = vset.pattern.permute.xlu2 %v367_v18  ;;  %vm242_vm6 = vcmask 319488  }
   0xa   :  { %286 = vmatpush.bf16.xpose.msra.mxu2 %v96_v7  ;;  %103 = vmatpush.bf16.xpose.msra.mxu0 %v96_v7  ;;  %v93_v11 = vsel %vm82_vm0, %v46_v8, 0  ;;  %v45_v14 = vpack.c.bf16 %v41_v13, %v40_v12  ;;  %v283_v16 = vld [vmem:[%s435_s1 + $0x8] sm:$0xff]  ;;  %v39_v37 = vld [vmem:[%s437_s3] sm:$0x1] }
   0xb   :  { %128 = vperm.xlu2 %299, %v35_v6   ;;  %v284_v40 = vld [vmem:[%s436_s2] sm:$0xff]  ;;  %v285_v41 = vld [vmem:[%s436_s2 + $0x8] sm:$0xff]  ;;  %s370_s2 = smov [#allocation5]  }
   0xc   :  { %v90_v15 = vsel %vm82_vm0, %v45_v14, 0  ;;  %s249_s3 = sshll.u32 %s370_s2, 4  ;;  %s250_s3 = int_to_ptr.vmem [resolvable:$true] %s249_s3 }
  0x10   :  { %69 = vperm.xlu0 %297, %v38_v9   ;;  %59 = vperm.xlu1 %298, %v36_v10  }
  0x12   :  { %287 = vmatpush.bf16.xpose.msra.mxu2 %v93_v11  ;;  %104 = vmatpush.bf16.xpose.msra.mxu0 %v93_v11 }
  0x13   :  { %132 = vperm.xlu2 %299, %v36_v10  }
  0x18   :  { %301 = vset.pattern.permute.xlu1 %v367_v18  ;;  %300 = vset.pattern.permute.xlu0 %v367_v18 }
  0x19   :  { %140 = vperm.xlu1 %301, %v38_v9   ;;  %136 = vperm.xlu0 %300, %v37_v5  }
  0x1a   :  { %288 = vmatpush.bf16.xpose.msra.mxu2 %v90_v15  ;;  %105 = vmatpush.bf16.xpose.msra.mxu0 %v90_v15 }
  0x1b   :  { %302 = vset.pattern.permute.xlu2 %v368_v26 }
  0x1c   :  { %184 = vperm.xlu2 %302, %v35_v6  }
  0x21   :  { %270 = vmatmul.msk.bf16.vlgmr.msra.gmra.mxu2 %vm82_vm0, %v283_v16  ;;  %269 = vmatmul.msk.bf16.vlgmr.msra.gmra.mxu0 %vm82_vm0, %v282_v17 }
  0x22   :  { %303 = vset.pattern.permute.xlu1 %v368_v26  ;;  %304 = vset.pattern.permute.xlu0 %v368_v26 }
  0x23   :  { %188 = vperm.xlu1 %303, %v36_v10   ;;  %196 = vperm.xlu0 %304, %v38_v9  }
  0x24   :  { %192 = vperm.xlu2 %302, %v37_v5  }
  0x2b   :  { %305 = vset.pattern.permute.xlu1 %v369_v38  ;;  %306 = vset.pattern.permute.xlu0 %v369_v38 }
  0x2c   :  { %219 = vperm.xlu1 %305, %v39_v37  }
  0x65   :  { %v129_v42 = vpop.permute.xlu2 %128 }
  0x6d   :  { %v133_v44 = vpop.permute.xlu2 %132 }
  0x76   :  { %v185_v48 = vpop.permute.xlu2 %184 }
  0x7a   :  { %v55_v20 = vpop.permute.xlu1 %54  ;;  %v65_v21 = vpop.permute.xlu0 %64 }
  0x7e   :  { %v193_v58 = vpop.permute.xlu2 %192 }
  0x82   :  { %v60_v24 = vpop.permute.xlu1 %59  ;;  %v70_v27 = vpop.permute.xlu0 %69 }
  0x8b   :  { %v141_v45 = vpop.permute.xlu1 %140  ;;  %v137_v49 = vpop.permute.xlu0 %136 }
  0x95   :  { %v189_v54 = vpop.permute.xlu1 %188  ;;  %v197_v0 = vpop.permute.xlu0 %196 }
  0x9e   :  { %v107_v19 = vpop.f32.mrf.mxu0  ;;  %v220_v14 = vpop.permute.xlu1 %219 }
  0x9f   :  { %v108_v29 = vadd.f32 %v107_v19, %v55_v20 }
  0xa1   :  { %v117_v34 = vmax.f32 %v108_v29, 0.0 }
  0xa4   :  { %v112_v22 = vpop.f32.mrf.mxu2 }
  0xa5   :  { %v113_v25 = vadd.f32 %v112_v22, %v65_v21 }
  0xa6   :  { %v109_v23 = vpop.f32.mrf.mxu0 }
  0xa7   :  { %v110_v30 = vadd.f32 %v109_v23, %v60_v24  ;;  %v119_v32 = vmax.f32 %v113_v25, 0.0 }
  0xa9   :  { %v118_v35 = vmax.f32 %v110_v30, 0.0 }
  0xab   :  { %v125_v39 = vpack.c.bf16 %v118_v35, %v117_v34 }
  0xac   :  { %v114_v28 = vpop.f32.mrf.mxu2 }
  0xad   :  { %v115_v31 = vadd.f32 %v114_v28, %v70_v27 }
  0xaf   :  { %v120_v33 = vmax.f32 %v115_v31, 0.0 }
  0xb1   :  { %v126_v36 = vpack.c.bf16 %v120_v33, %v119_v32 }
  0xb3   :  { %166 = vmatpush.bf16.msra.mxu1 %v126_v36 }
  0xb7   :  { %167 = vmatpush.bf16.msra.mxu1 %v125_v39 }
  0xba   :  { %279 = vmatmul.msk.bf16.vlgmr.msra.gmra.mxu1 %vm153_vm1, %v284_v40 }
  0xca   :  { %280 = vmatmul.msk.bf16.gmra.mxu1 %vm153_vm1, %v285_v41 }
 0x137   :  { %v169_v43 = vpop.f32.mrf.mxu1 }
 0x138   :  { %v170_v50 = vadd.f32 %v169_v43, %v129_v42 }
 0x13a   :  { %v179_v55 = vmax.f32 %v170_v50, 0.0 }
 0x13c   :  { %v199_v59 = vmul.f32 %v185_v48, %v179_v55 }
 0x13e   :  { %v204_v1 = vsel %vm203_vm2, %v199_v59, 0.0 }
 0x13f   :  { %v171_v46 = vpop.f32.mrf.mxu1 }
 0x140   :  { %v172_v47 = vadd.f32 %v171_v46, %v133_v44 }
 0x142   :  { %v180_v52 = vmax.f32 %v172_v47, 0.0 }
 0x144   :  { %v200_v57 = vmul.f32 %v189_v54, %v180_v52 }
 0x146   :  { %v205_v62 = vsel %vm203_vm2, %v200_v57, 0.0 }
 0x147   :  { %v174_v51 = vpop.f32.mrf.mxu1  ;;  %v206_v4 = vadd.f32 %v205_v62, %v204_v1 }
 0x148   :  { %v175_v53 = vadd.f32 %v174_v51, %v137_v49 }
 0x14a   :  { %v181_v56 = vmax.f32 %v175_v53, 0.0 }
 0x14c   :  { %v201_v60 = vmul.f32 %v193_v58, %v181_v56 }
 0x14e   :  { %v207_v2 = vsel %vm203_vm2, %v201_v60, 0.0 }
 0x14f   :  { %v176_v61 = vpop.f32.mrf.mxu1  ;;  %v208_v6 = vadd.f32 %v207_v2, %v206_v4 }
 0x150   :  { %v177_v63 = vadd.f32 %v176_v61, %v141_v45 }
 0x152   :  { %v182_v3 = vmax.f32 %v177_v63, 0.0 }
 0x154   :  { %v202_v5 = vmul.f32 %v197_v0, %v182_v3 }
 0x156   :  { %v209_v7 = vsel %vm203_vm2, %v202_v5, 0.0 }
 0x157   :  { %v210_v8 = vadd.f32 %v209_v7, %v208_v6 }
 0x159   :  { %v211_v9 = vrot.slane %v210_v8, 4 }
 0x15b   :  { %v212_v10 = vadd.f32 %v211_v9, %v210_v8 }
 0x15d   :  { %v213_v11 = vrot.slane %v212_v10, 2 }
 0x15f   :  { %v214_v12 = vadd.f32 %v213_v11, %v212_v10 }
 0x161   :  { %v215_v13 = vrot.slane %v214_v12, 1 }
 0x163   :  { %v216_v15 = vadd.f32 %v215_v13, %v214_v12 }
 0x165   :  { %v222_v16 = vadd.f32 %v220_v14, %v216_v15 }
 0x167   :  { %v281_v17 = vmul.f32 -1.442695, %v222_v16 }
 0x169   :  { %307 = vpow2.f32 %v281_v17 }
 0x16f   :  { %v308_v18 = vpop.eup %307 }
 0x170   :  { %v226_v19 = vadd.f32 1.0, %v308_v18 }
 0x172   :  { %309 = vrcp.f32 %v226_v19  ;;  %v238_v23 = vand.u32 2147483648, %v226_v19  ;;  %v236_v25 = vand.u32 2147483647, %v226_v19  ;;  %vm232_vm4 = vweird.f32 %v226_v19 }
 0x174   :  { %v239_v27 = vor.u32 1.1754944e-38, %v238_v23  ;;  %vm237_vm7 = vcmp.eq.f32.partialorder %v236_v25, 8.507059e+37 }
 0x178   :  { %v310_v20 = vpop.eup %309 }
 0x179   :  { %v228_v21 = vmul.f32 %v310_v20, %v226_v19  ;;  %vm233_vm3 = vweird.f32 %v310_v20 }
 0x17a   :  { %vm234_vm5 = vmor %vm232_vm4, %vm233_vm3 }
 0x17b   :  { %v229_v22 = vsub.f32 1.0, %v228_v21 }
 0x17d   :  { %v230_v24 = vmul.f32 %v310_v20, %v229_v22 }
 0x17f   :  { %v231_v26 = vadd.f32 %v310_v20, %v230_v24 }
 0x181   :  { %v235_v28 = vsel %vm234_vm5, %v310_v20, %v231_v26 }
 0x182   :  { %v240_v29 = vsel %vm237_vm7, %v239_v27, %v235_v28 }
 0x183   :  { %243 = vst.msk [vmem:[#allocation5] sm:$0x1] %vm242_vm6, %v240_v29 }
 0x184   :  { %254 = dma.vmem_to_hbm [thread:$0]  %s250_s3, 16, %s252_s14, [#allocation4]  }
 0x185   :  { %361 = dma.done.wait [#allocation4], 16  }
 0x186   :  { %362 = vsyncadd [#allocation4], 4294967280 }
 0x187   :  { %259 = vsyncpa [#allocation3], 1 }
 0x188   :  { %260 = vsyncpa [#allocation4], 1 }

</bundles_post_ra>
